<compile_context>
chip_gen: v6e
topology: v6e:2x2x1
jax: 0.10.0
libtpu: 0.0.40
codegen_flags: <defaults>
</compile_context>

<pallas_src>
import functools
import math

import jax
import jax.numpy as jnp
from jax.experimental import pallas as pl
from jax.experimental.pallas import tpu as pltpu

EPS = 1e-5                      # nn.GroupNorm default eps
INV_SQRT2 = 1.0 / math.sqrt(2.0)


# ----------------------------------------------------------------------------
# Fused NormResidualBlock kernel (one grid step == one batch sample)
# ----------------------------------------------------------------------------
def _block_kernel(x_ref, cond_ref, e_ref, wdp_ref, bdp_ref, wd_ref, bd_ref,
                  wc_ref, bc_ref, wo_ref, bo_ref, gamma_ref, beta_ref,
                  out_ref, ypad_ref, *, dilation, use_norm):
    T = x_ref.shape[1]
    C = x_ref.shape[2]
    dil = dilation

    x = x_ref[0]                                                     # (T, C) f32

    # ---- diffusion_projection: Linear(C, C) on this sample's row ------------
    d = jnp.dot(e_ref[0].astype(jnp.bfloat16), wdp_ref[...],
                preferred_element_type=jnp.float32) + bdp_ref[...]   # (1, C)
    y = x + d                                                        # broadcast over time

    # ---- dilated conv: kernel 3, zero padding == dilation -------------------
    # Padded time buffer in VMEM scratch; the 3 taps are static slices of it,
    # stacked along channels and contracted in a single K=3C matmul.
    ypad_ref[pl.ds(0, dil), :] = jnp.zeros((dil, C), jnp.float32)
    ypad_ref[pl.ds(dil, T), :] = y
    ypad_ref[pl.ds(T + dil, dil), :] = jnp.zeros((dil, C), jnp.float32)
    taps = jnp.concatenate(
        [ypad_ref[pl.ds(0, T), :],                 # y[t - dil]   (tap k = 0)
         ypad_ref[pl.ds(dil, T), :],               # y[t]         (tap k = 1)
         ypad_ref[pl.ds(2 * dil, T), :]],          # y[t + dil]   (tap k = 2)
        axis=-1).astype(jnp.bfloat16)              # (T, 3C)
    z = jnp.dot(taps, wd_ref[...],
                preferred_element_type=jnp.float32) + bd_ref[...]    # (T, 2C)

    # ---- GroupNorm(num_groups == num_channels): per-channel norm over T -----
    if use_norm:
        inv_t = 1.0 / float(T)
        mu = jnp.sum(z, axis=0, keepdims=True) * inv_t               # (1, 2C)
        ms = jnp.sum(z * z, axis=0, keepdims=True) * inv_t           # E[z^2]
        var = jnp.maximum(ms - mu * mu, 0.0)                         # biased var
        scale = gamma_ref[...] * jax.lax.rsqrt(var + EPS)
        shift = beta_ref[...] - mu * scale
        z = z * scale + shift

    # ---- conditioner projection (1x1 conv) + gated activation ---------------
    cz = jnp.dot(cond_ref[0].astype(jnp.bfloat16), wc_ref[...],
                 preferred_element_type=jnp.float32) + bc_ref[...]   # (T, 2C)
    y2 = z + cz
    g = jax.nn.sigmoid(y2[:, :C]) * jnp.tanh(y2[:, C:])              # (T, C)

    # ---- output projection (1x1 conv); residual ‖ skip as one dense slab ----
    w = jnp.dot(g.astype(jnp.bfloat16), wo_ref[...],
                preferred_element_type=jnp.float32) + bo_ref[...]    # (T, 2C)
    out_ref[0] = jnp.concatenate(
        [(x + w[:, :C]) * INV_SQRT2, w[:, C:]], axis=-1)             # (T, 2C)


def norm_residual_block(params, x, conditioner, diffusion_step,
                        *, dilation, use_norm=True):
    """x: (B, C, T), conditioner: (B, E, T), diffusion_step: (B, C).
    Returns ((x + residual)/sqrt(2), skip), each (B, C, T)."""
    B, C, T = x.shape
    E = conditioner.shape[1]

    x_t = jnp.transpose(x, (0, 2, 1)).astype(jnp.float32)               # (B, T, C)
    cond_t = jnp.transpose(conditioner, (0, 2, 1)).astype(jnp.float32)  # (B, T, E)
    e = diffusion_step.astype(jnp.float32).reshape(B, 1, C)             # (B, 1, C)

    # bf16 operands for every MXU matmul (accumulation stays f32 in-kernel)
    wdp = params["wdp"].astype(jnp.bfloat16)
    wd = params["wd"].astype(jnp.bfloat16)
    wc = params["wc"].astype(jnp.bfloat16)
    wo = params["wo"].astype(jnp.bfloat16)

    grid_spec = pltpu.PrefetchScalarGridSpec(
        num_scalar_prefetch=0,
        grid=(B,),
        in_specs=[
            pl.BlockSpec((1, T, C), lambda b: (b, 0, 0)),        # x (channels-last)
            pl.BlockSpec((1, T, E), lambda b: (b, 0, 0)),        # conditioner
            pl.BlockSpec((1, 1, C), lambda b: (b, 0, 0)),        # diffusion step row
            pl.BlockSpec((C, C), lambda b: (0, 0)),              # diffusion proj W
            pl.BlockSpec((1, C), lambda b: (0, 0)),              # diffusion proj bias
            pl.BlockSpec((3 * C, 2 * C), lambda b: (0, 0)),      # dilated conv W (tap-stacked)
            pl.BlockSpec((1, 2 * C), lambda b: (0, 0)),          # dilated conv bias
            pl.BlockSpec((E, 2 * C), lambda b: (0, 0)),          # conditioner 1x1 W
            pl.BlockSpec((1, 2 * C), lambda b: (0, 0)),          # conditioner 1x1 bias
            pl.BlockSpec((C, 2 * C), lambda b: (0, 0)),          # output 1x1 W
            pl.BlockSpec((1, 2 * C), lambda b: (0, 0)),          # output 1x1 bias
            pl.BlockSpec((1, 2 * C), lambda b: (0, 0)),          # GroupNorm gamma
            pl.BlockSpec((1, 2 * C), lambda b: (0, 0)),          # GroupNorm beta
        ],
        out_specs=pl.BlockSpec((1, T, 2 * C), lambda b: (b, 0, 0)),  # res ‖ skip
        scratch_shapes=[
            pltpu.VMEM((T + 2 * dilation, C), jnp.float32),      # time-padded y
        ],
    )

    out = pl.pallas_call(
        functools.partial(_block_kernel, dilation=dilation, use_norm=use_norm),
        grid_spec=grid_spec,
        out_shape=jax.ShapeDtypeStruct((B, T, 2 * C), jnp.float32),
        compiler_params=pltpu.CompilerParams(
            dimension_semantics=("parallel",)),
    )(x_t, cond_t, e, wdp, params["bdp"], wd, params["bd"], wc, params["bc"],
      wo, params["bo"], params["gamma"], params["beta"])

    res = jnp.transpose(out[..., :C], (0, 2, 1))
    skip = jnp.transpose(out[..., C:], (0, 2, 1))
    return res, skip


# ----------------------------------------------------------------------------
# Pure-JAX reference (mirrors the PyTorch forward, f32 everywhere)
# ----------------------------------------------------------------------------
def reference_forward(p, x, cond, dstep, dilation, use_norm):
    xt = jnp.transpose(x, (0, 2, 1))          # (B, T, C)
    ct = jnp.transpose(cond, (0, 2, 1))       # (B, T, E)
    B, T, C = xt.shape

    d = dstep @ p["wdp"] + p["bdp"]           # (B, C)
    y = xt + d[:, None, :]

    ypad = jnp.pad(y, ((0, 0), (dilation, dilation), (0, 0)))
    taps = jnp.concatenate(
        [ypad[:, 0:T], ypad[:, dilation:dilation + T],
         ypad[:, 2 * dilation:2 * dilation + T]], axis=-1)            # (B, T, 3C)
    z = taps @ p["wd"] + p["bd"]                                      # (B, T, 2C)
    if use_norm:
        mu = jnp.mean(z, axis=1, keepdims=True)
        var = jnp.mean(jnp.square(z - mu), axis=1, keepdims=True)
        z = (z - mu) * jax.lax.rsqrt(var + EPS) * p["gamma"] + p["beta"]
    cz = ct @ p["wc"] + p["bc"]
    y2 = z + cz
    g = jax.nn.sigmoid(y2[..., :C]) * jnp.tanh(y2[..., C:])
    w = g @ p["wo"] + p["bo"]
    res = (xt + w[..., :C]) * INV_SQRT2
    skip = w[..., C:]
    return jnp.transpose(res, (0, 2, 1)), jnp.transpose(skip, (0, 2, 1))


# ----------------------------------------------------------------------------
# deterministic synthetic parameters (shapes follow the torch __init__)
#   torch layouts -> kernel layouts:
#     Linear(C,C).weight (C,C)          -> wdp = weight.T               (C, C)
#     Conv1d(C,2C,3).weight (2C,C,3)    -> wd  = weight.permute(2,1,0)
#                                                .reshape(3C, 2C)  (tap-major)
#     Conv1d(E,2C,1).weight (2C,E,1)    -> wc  = weight[:, :, 0].T      (E, 2C)
#     Conv1d(C,2C,1).weight (2C,C,1)    -> wo  = weight[:, :, 0].T      (C, 2C)
# ----------------------------------------------------------------------------
def init_params(key, C, E):
    ks = jax.random.split(key, 8)

    def kaiming(k, shape, fan_in):
        return jax.random.normal(k, shape, jnp.float32) * math.sqrt(2.0 / fan_in)

    p = {}
    p["wdp"] = jax.random.normal(ks[0], (C, C), jnp.float32) / math.sqrt(C)
    p["bdp"] = jax.random.normal(ks[1], (1, C), jnp.float32) * 0.1
    p["wd"] = kaiming(ks[2], (3 * C, 2 * C), 3 * C)
    p["bd"] = jax.random.normal(ks[3], (1, 2 * C), jnp.float32) * 0.1
    p["wc"] = kaiming(ks[4], (E, 2 * C), E)
    p["bc"] = jax.random.normal(ks[5], (1, 2 * C), jnp.float32) * 0.1
    p["wo"] = kaiming(ks[6], (C, 2 * C), C)
    p["bo"] = jax.random.normal(ks[7], (1, 2 * C), jnp.float32) * 0.1
    p["gamma"] = jnp.ones((1, 2 * C), jnp.float32)   # GroupNorm affine defaults
    p["beta"] = jnp.zeros((1, 2 * C), jnp.float32)
    return p


if __name__ == "__main__":
    key = jax.random.PRNGKey(0)
    B, T = 2, 16
    C = 64          # residual_channels  (2C = 128 -> lane-dense output slab)
    E = 64          # encoder_hidden
    dilation = 2
    use_norm = True

    k1, k2, k3, kp = jax.random.split(key, 4)
    x = jax.random.normal(k1, (B, C, T), jnp.float32)
    cond = jax.random.normal(k2, (B, E, T), jnp.float32)
    dstep = jax.random.normal(k3, (B, C), jnp.float32)
    params = init_params(kp, C, E)

    res, skip = norm_residual_block(params, x, cond, dstep,
                                    dilation=dilation, use_norm=use_norm)
    res, skip = jax.block_until_ready((res, skip))
    assert res.shape == (B, C, T), res.shape
    assert skip.shape == (B, C, T), skip.shape

    # loose tolerance: kernel uses bf16 MXU operands, reference is pure f32
    ref_res, ref_skip = reference_forward(params, x, cond, dstep, dilation, use_norm)
    assert jnp.allclose(res, ref_res, atol=1e-1, rtol=1e-1), \
        float(jnp.max(jnp.abs(res - ref_res)))
    assert jnp.allclose(skip, ref_skip, atol=1e-1, rtol=1e-1), \
        float(jnp.max(jnp.abs(skip - ref_skip)))

    print("KERNEL_OK")
</pallas_src>

<mosaic_0001>
module attributes {stable_mosaic.version = 11 : i64} {
  func.func @_block_kernel(%arg0: i32, %arg1: memref<1x16x64xf32, #tpu.memory_space<vmem>>, %arg2: memref<1x16x64xf32, #tpu.memory_space<vmem>>, %arg3: memref<1x1x64xf32, #tpu.memory_space<vmem>>, %arg4: memref<64x64xbf16, #tpu.memory_space<vmem>>, %arg5: memref<1x64xf32, #tpu.memory_space<vmem>>, %arg6: memref<192x128xbf16, #tpu.memory_space<vmem>>, %arg7: memref<1x128xf32, #tpu.memory_space<vmem>>, %arg8: memref<64x128xbf16, #tpu.memory_space<vmem>>, %arg9: memref<1x128xf32, #tpu.memory_space<vmem>>, %arg10: memref<64x128xbf16, #tpu.memory_space<vmem>>, %arg11: memref<1x128xf32, #tpu.memory_space<vmem>>, %arg12: memref<1x128xf32, #tpu.memory_space<vmem>>, %arg13: memref<1x128xf32, #tpu.memory_space<vmem>>, %arg14: memref<1x16x128xf32, #tpu.memory_space<vmem>>, %arg15: memref<20x64xf32, #tpu.memory_space<vmem>>) attributes {dimension_semantics = [#tpu.dimension_semantics<parallel>], iteration_bounds = array<i64: 2>, scalar_prefetch = 0 : i64, scratch_operands = 1 : i64, tpu.core_type = #tpu.core_type<tc>, window_params = [{transform_indices = @transform_0, window_bounds = array<i64: 1, 16, 64>}, {transform_indices = @transform_1, window_bounds = array<i64: 1, 16, 64>}, {transform_indices = @transform_2, window_bounds = array<i64: 1, 1, 64>}, {pipeline_mode = #tpu.pipeline_mode<synchronous>, transform_indices = @transform_3, window_bounds = array<i64: 64, 64>}, {pipeline_mode = #tpu.pipeline_mode<synchronous>, transform_indices = @transform_4, window_bounds = array<i64: 1, 64>}, {pipeline_mode = #tpu.pipeline_mode<synchronous>, transform_indices = @transform_5, window_bounds = array<i64: 192, 128>}, {pipeline_mode = #tpu.pipeline_mode<synchronous>, transform_indices = @transform_6, window_bounds = array<i64: 1, 128>}, {pipeline_mode = #tpu.pipeline_mode<synchronous>, transform_indices = @transform_7, window_bounds = array<i64: 64, 128>}, {pipeline_mode = #tpu.pipeline_mode<synchronous>, transform_indices = @transform_8, window_bounds = array<i64: 1, 128>}, {pipeline_mode = #tpu.pipeline_mode<synchronous>, transform_indices = @transform_9, window_bounds = array<i64: 64, 128>}, {pipeline_mode = #tpu.pipeline_mode<synchronous>, transform_indices = @transform_10, window_bounds = array<i64: 1, 128>}, {pipeline_mode = #tpu.pipeline_mode<synchronous>, transform_indices = @transform_11, window_bounds = array<i64: 1, 128>}, {pipeline_mode = #tpu.pipeline_mode<synchronous>, transform_indices = @transform_12, window_bounds = array<i64: 1, 128>}, {transform_indices = @transform_13, window_bounds = array<i64: 1, 16, 128>}]} {
    %c0 = arith.constant 0 : index
    %c0_0 = arith.constant 0 : index
    %c0_1 = arith.constant 0 : index
    %0 = vector.load %arg1[%c0, %c0_0, %c0_1] : memref<1x16x64xf32, #tpu.memory_space<vmem>>, vector<1x16x64xf32>
    %1 = vector.shape_cast %0 : vector<1x16x64xf32> to vector<16x64xf32>
    %c0_2 = arith.constant 0 : index
    %c0_3 = arith.constant 0 : index
    %c0_4 = arith.constant 0 : index
    %2 = vector.load %arg3[%c0_2, %c0_3, %c0_4] : memref<1x1x64xf32, #tpu.memory_space<vmem>>, vector<1x1x64xf32>
    %3 = vector.shape_cast %2 : vector<1x1x64xf32> to vector<1x64xf32>
    %4 = arith.truncf %3 : vector<1x64xf32> to vector<1x64xbf16>
    %c0_5 = arith.constant 0 : index
    %c0_6 = arith.constant 0 : index
    %5 = vector.load %arg4[%c0_5, %c0_6] : memref<64x64xbf16, #tpu.memory_space<vmem>>, vector<64x64xbf16>
    %cst = arith.constant dense<0.000000e+00> : vector<1x64xf32>
    %6 = tpu.matmul %4, %5, %cst {dimension_numbers = #tpu.dot_dimension_numbers<[1], [0], [0], [1], [0, 0, 1, 1], [], []>} : vector<1x64xbf16>, vector<64x64xbf16>, vector<1x64xf32> -> vector<1x64xf32>
    %c0_7 = arith.constant 0 : index
    %c0_8 = arith.constant 0 : index
    %7 = vector.load %arg5[%c0_7, %c0_8] : memref<1x64xf32, #tpu.memory_space<vmem>>, vector<1x64xf32>
    %8 = arith.addf %6, %7 : vector<1x64xf32>
    %9 = vector.broadcast %8 : vector<1x64xf32> to vector<16x64xf32>
    %10 = arith.addf %1, %9 : vector<16x64xf32>
    %cst_9 = arith.constant 0.000000e+00 : f32
    %11 = vector.broadcast %cst_9 : f32 to vector<2x64xf32>
    %c0_10 = arith.constant 0 : index
    %c0_11 = arith.constant 0 : index
    %12 = vector.load %arg15[%c0_10, %c0_11] : memref<20x64xf32, #tpu.memory_space<vmem>>, vector<2x64xf32>
    tpu.vector_store %arg15[%c0_10, %c0_11], %11 {strides = array<i32>} : memref<20x64xf32, #tpu.memory_space<vmem>>, vector<2x64xf32>,
    %c2 = arith.constant 2 : index
    %c0_12 = arith.constant 0 : index
    %13 = vector.load %arg15[%c2, %c0_12] : memref<20x64xf32, #tpu.memory_space<vmem>>, vector<16x64xf32>
    tpu.vector_store %arg15[%c2, %c0_12], %10 {strides = array<i32>} : memref<20x64xf32, #tpu.memory_space<vmem>>, vector<16x64xf32>,
    %cst_13 = arith.constant 0.000000e+00 : f32
    %14 = vector.broadcast %cst_13 : f32 to vector<2x64xf32>
    %c18 = arith.constant 18 : index
    %c0_14 = arith.constant 0 : index
    %15 = vector.load %arg15[%c18, %c0_14] : memref<20x64xf32, #tpu.memory_space<vmem>>, vector<2x64xf32>
    tpu.vector_store %arg15[%c18, %c0_14], %14 {strides = array<i32>} : memref<20x64xf32, #tpu.memory_space<vmem>>, vector<2x64xf32>,
    %c0_15 = arith.constant 0 : index
    %c0_16 = arith.constant 0 : index
    %16 = vector.load %arg15[%c0_15, %c0_16] : memref<20x64xf32, #tpu.memory_space<vmem>>, vector<16x64xf32>
    %c2_17 = arith.constant 2 : index
    %c0_18 = arith.constant 0 : index
    %17 = vector.load %arg15[%c2_17, %c0_18] : memref<20x64xf32, #tpu.memory_space<vmem>>, vector<16x64xf32>
    %c4 = arith.constant 4 : index
    %c0_19 = arith.constant 0 : index
    %18 = vector.load %arg15[%c4, %c0_19] : memref<20x64xf32, #tpu.memory_space<vmem>>, vector<16x64xf32>
    %19 = tpu.concatenate %16, %17, %18 in 1 : vector<16x64xf32>, vector<16x64xf32>, vector<16x64xf32> -> vector<16x192xf32>
    %20 = arith.truncf %19 : vector<16x192xf32> to vector<16x192xbf16>
    %c0_20 = arith.constant 0 : index
    %c0_21 = arith.constant 0 : index
    %21 = vector.load %arg6[%c0_20, %c0_21] : memref<192x128xbf16, #tpu.memory_space<vmem>>, vector<192x128xbf16>
    %cst_22 = arith.constant dense<0.000000e+00> : vector<16x128xf32>
    %22 = tpu.matmul %20, %21, %cst_22 {dimension_numbers = #tpu.dot_dimension_numbers<[1], [0], [0], [1], [0, 0, 1, 1], [], []>} : vector<16x192xbf16>, vector<192x128xbf16>, vector<16x128xf32> -> vector<16x128xf32>
    %c0_23 = arith.constant 0 : index
    %c0_24 = arith.constant 0 : index
    %23 = vector.load %arg7[%c0_23, %c0_24] : memref<1x128xf32, #tpu.memory_space<vmem>>, vector<1x128xf32>
    %24 = vector.broadcast %23 : vector<1x128xf32> to vector<16x128xf32>
    %25 = arith.addf %22, %24 : vector<16x128xf32>
    %cst_25 = arith.constant dense<0.000000e+00> : vector<128xf32>
    %26 = vector.multi_reduction <add>, %25, %cst_25 [0] : vector<16x128xf32> to vector<128xf32>
    %27 = vector.shape_cast %26 : vector<128xf32> to vector<1x128xf32>
    %cst_26 = arith.constant 6.250000e-02 : f32
    %28 = vector.broadcast %cst_26 : f32 to vector<1x128xf32>
    %29 = arith.mulf %27, %28 : vector<1x128xf32>
    %30 = arith.mulf %25, %25 : vector<16x128xf32>
    %cst_27 = arith.constant dense<0.000000e+00> : vector<128xf32>
    %31 = vector.multi_reduction <add>, %30, %cst_27 [0] : vector<16x128xf32> to vector<128xf32>
    %32 = vector.shape_cast %31 : vector<128xf32> to vector<1x128xf32>
    %cst_28 = arith.constant 6.250000e-02 : f32
    %33 = vector.broadcast %cst_28 : f32 to vector<1x128xf32>
    %34 = arith.mulf %32, %33 : vector<1x128xf32>
    %35 = arith.mulf %29, %29 : vector<1x128xf32>
    %36 = arith.subf %34, %35 : vector<1x128xf32>
    %cst_29 = arith.constant 0.000000e+00 : f32
    %37 = vector.broadcast %cst_29 : f32 to vector<1x128xf32>
    %38 = arith.maximumf %36, %37 : vector<1x128xf32>
    %c0_30 = arith.constant 0 : index
    %c0_31 = arith.constant 0 : index
    %39 = vector.load %arg12[%c0_30, %c0_31] : memref<1x128xf32, #tpu.memory_space<vmem>>, vector<1x128xf32>
    %cst_32 = arith.constant 9.99999974E-6 : f32
    %40 = vector.broadcast %cst_32 : f32 to vector<1x128xf32>
    %41 = arith.addf %38, %40 : vector<1x128xf32>
    %42 = math.rsqrt %41 : vector<1x128xf32>
    %43 = arith.mulf %39, %42 : vector<1x128xf32>
    %c0_33 = arith.constant 0 : index
    %c0_34 = arith.constant 0 : index
    %44 = vector.load %arg13[%c0_33, %c0_34] : memref<1x128xf32, #tpu.memory_space<vmem>>, vector<1x128xf32>
    %45 = arith.mulf %29, %43 : vector<1x128xf32>
    %46 = arith.subf %44, %45 : vector<1x128xf32>
    %47 = vector.broadcast %43 : vector<1x128xf32> to vector<16x128xf32>
    %48 = arith.mulf %25, %47 : vector<16x128xf32>
    %49 = vector.broadcast %46 : vector<1x128xf32> to vector<16x128xf32>
    %50 = arith.addf %48, %49 : vector<16x128xf32>
    %c0_35 = arith.constant 0 : index
    %c0_36 = arith.constant 0 : index
    %c0_37 = arith.constant 0 : index
    %51 = vector.load %arg2[%c0_35, %c0_36, %c0_37] : memref<1x16x64xf32, #tpu.memory_space<vmem>>, vector<1x16x64xf32>
    %52 = vector.shape_cast %51 : vector<1x16x64xf32> to vector<16x64xf32>
    %53 = arith.truncf %52 : vector<16x64xf32> to vector<16x64xbf16>
    %c0_38 = arith.constant 0 : index
    %c0_39 = arith.constant 0 : index
    %54 = vector.load %arg8[%c0_38, %c0_39] : memref<64x128xbf16, #tpu.memory_space<vmem>>, vector<64x128xbf16>
    %cst_40 = arith.constant dense<0.000000e+00> : vector<16x128xf32>
    %55 = tpu.matmul %53, %54, %cst_40 {dimension_numbers = #tpu.dot_dimension_numbers<[1], [0], [0], [1], [0, 0, 1, 1], [], []>} : vector<16x64xbf16>, vector<64x128xbf16>, vector<16x128xf32> -> vector<16x128xf32>
    %c0_41 = arith.constant 0 : index
    %c0_42 = arith.constant 0 : index
    %56 = vector.load %arg9[%c0_41, %c0_42] : memref<1x128xf32, #tpu.memory_space<vmem>>, vector<1x128xf32>
    %57 = vector.broadcast %56 : vector<1x128xf32> to vector<16x128xf32>
    %58 = arith.addf %55, %57 : vector<16x128xf32>
    %59 = arith.addf %50, %58 : vector<16x128xf32>
    %60 = vector.extract_strided_slice %59 {offsets = [0, 0], sizes = [16, 64], strides = [1, 1]} : vector<16x128xf32> to vector<16x64xf32>
    %61 = arith.negf %60 : vector<16x64xf32>
    %62 = math.exp %61 : vector<16x64xf32>
    %cst_43 = arith.constant 1.000000e+00 : f32
    %63 = vector.broadcast %cst_43 : f32 to vector<16x64xf32>
    %64 = arith.addf %63, %62 : vector<16x64xf32>
    %65 = arith.divf %63, %64 : vector<16x64xf32>
    %66 = vector.extract_strided_slice %59 {offsets = [0, 64], sizes = [16, 64], strides = [1, 1]} : vector<16x128xf32> to vector<16x64xf32>
    %67 = math.tanh %66 : vector<16x64xf32>
    %68 = arith.mulf %65, %67 : vector<16x64xf32>
    %69 = arith.truncf %68 : vector<16x64xf32> to vector<16x64xbf16>
    %c0_44 = arith.constant 0 : index
    %c0_45 = arith.constant 0 : index
    %70 = vector.load %arg10[%c0_44, %c0_45] : memref<64x128xbf16, #tpu.memory_space<vmem>>, vector<64x128xbf16>
    %cst_46 = arith.constant dense<0.000000e+00> : vector<16x128xf32>
    %71 = tpu.matmul %69, %70, %cst_46 {dimension_numbers = #tpu.dot_dimension_numbers<[1], [0], [0], [1], [0, 0, 1, 1], [], []>} : vector<16x64xbf16>, vector<64x128xbf16>, vector<16x128xf32> -> vector<16x128xf32>
    %c0_47 = arith.constant 0 : index
    %c0_48 = arith.constant 0 : index
    %72 = vector.load %arg11[%c0_47, %c0_48] : memref<1x128xf32, #tpu.memory_space<vmem>>, vector<1x128xf32>
    %73 = vector.broadcast %72 : vector<1x128xf32> to vector<16x128xf32>
    %74 = arith.addf %71, %73 : vector<16x128xf32>
    %75 = vector.extract_strided_slice %74 {offsets = [0, 0], sizes = [16, 64], strides = [1, 1]} : vector<16x128xf32> to vector<16x64xf32>
    %76 = arith.addf %1, %75 : vector<16x64xf32>
    %cst_49 = arith.constant 0.707106769 : f32
    %77 = vector.broadcast %cst_49 : f32 to vector<16x64xf32>
    %78 = arith.mulf %76, %77 : vector<16x64xf32>
    %79 = vector.extract_strided_slice %74 {offsets = [0, 64], sizes = [16, 64], strides = [1, 1]} : vector<16x128xf32> to vector<16x64xf32>
    %80 = tpu.concatenate %78, %79 in 1 : vector<16x64xf32>, vector<16x64xf32> -> vector<16x128xf32>
    %c0_50 = arith.constant 0 : index
    %c0_51 = arith.constant 0 : index
    %c0_52 = arith.constant 0 : index
    %81 = vector.load %arg14[%c0_50, %c0_51, %c0_52] : memref<1x16x128xf32, #tpu.memory_space<vmem>>, vector<1x16x128xf32>
    %82 = vector.shape_cast %81 : vector<1x16x128xf32> to vector<16x128xf32>
    %83 = vector.shape_cast %80 : vector<16x128xf32> to vector<1x16x128xf32>
    tpu.vector_store %arg14[%c0_50, %c0_51, %c0_52], %83 {strides = array<i32>} : memref<1x16x128xf32, #tpu.memory_space<vmem>>, vector<1x16x128xf32>,
    return
  }
  func.func @transform_0(%arg0: i32) -> (i32, i32, i32) {
    %c0_i32 = arith.constant 0 : i32
    %c0_i32_0 = arith.constant 0 : i32
    %c0_i32_1 = arith.constant 0 : i32
    return %arg0, %c0_i32, %c0_i32_0 : i32, i32, i32
  }
  func.func @transform_1(%arg0: i32) -> (i32, i32, i32) {
    %c0_i32 = arith.constant 0 : i32
    %c0_i32_0 = arith.constant 0 : i32
    %c0_i32_1 = arith.constant 0 : i32
    return %arg0, %c0_i32, %c0_i32_0 : i32, i32, i32
  }
  func.func @transform_2(%arg0: i32) -> (i32, i32, i32) {
    %c0_i32 = arith.constant 0 : i32
    %c0_i32_0 = arith.constant 0 : i32
    %c0_i32_1 = arith.constant 0 : i32
    return %arg0, %c0_i32, %c0_i32_0 : i32, i32, i32
  }
  func.func @transform_3(%arg0: i32) -> (i32, i32) {
    %c0_i32 = arith.constant 0 : i32
    %c0_i32_0 = arith.constant 0 : i32
    %c0_i32_1 = arith.constant 0 : i32
    return %c0_i32, %c0_i32_0 : i32, i32
  }
  func.func @transform_4(%arg0: i32) -> (i32, i32) {
    %c0_i32 = arith.constant 0 : i32
    %c0_i32_0 = arith.constant 0 : i32
    %c0_i32_1 = arith.constant 0 : i32
    return %c0_i32, %c0_i32_0 : i32, i32
  }
  func.func @transform_5(%arg0: i32) -> (i32, i32) {
    %c0_i32 = arith.constant 0 : i32
    %c0_i32_0 = arith.constant 0 : i32
    %c0_i32_1 = arith.constant 0 : i32
    return %c0_i32, %c0_i32_0 : i32, i32
  }
  func.func @transform_6(%arg0: i32) -> (i32, i32) {
    %c0_i32 = arith.constant 0 : i32
    %c0_i32_0 = arith.constant 0 : i32
    %c0_i32_1 = arith.constant 0 : i32
    return %c0_i32, %c0_i32_0 : i32, i32
  }
  func.func @transform_7(%arg0: i32) -> (i32, i32) {
    %c0_i32 = arith.constant 0 : i32
    %c0_i32_0 = arith.constant 0 : i32
    %c0_i32_1 = arith.constant 0 : i32
    return %c0_i32, %c0_i32_0 : i32, i32
  }
  func.func @transform_8(%arg0: i32) -> (i32, i32) {
    %c0_i32 = arith.constant 0 : i32
    %c0_i32_0 = arith.constant 0 : i32
    %c0_i32_1 = arith.constant 0 : i32
    return %c0_i32, %c0_i32_0 : i32, i32
  }
  func.func @transform_9(%arg0: i32) -> (i32, i32) {
    %c0_i32 = arith.constant 0 : i32
    %c0_i32_0 = arith.constant 0 : i32
    %c0_i32_1 = arith.constant 0 : i32
    return %c0_i32, %c0_i32_0 : i32, i32
  }
  func.func @transform_10(%arg0: i32) -> (i32, i32) {
    %c0_i32 = arith.constant 0 : i32
    %c0_i32_0 = arith.constant 0 : i32
    %c0_i32_1 = arith.constant 0 : i32
    return %c0_i32, %c0_i32_0 : i32, i32
  }
  func.func @transform_11(%arg0: i32) -> (i32, i32) {
    %c0_i32 = arith.constant 0 : i32
    %c0_i32_0 = arith.constant 0 : i32
    %c0_i32_1 = arith.constant 0 : i32
    return %c0_i32, %c0_i32_0 : i32, i32
  }
  func.func @transform_12(%arg0: i32) -> (i32, i32) {
    %c0_i32 = arith.constant 0 : i32
    %c0_i32_0 = arith.constant 0 : i32
    %c0_i32_1 = arith.constant 0 : i32
    return %c0_i32, %c0_i32_0 : i32, i32
  }
  func.func @transform_13(%arg0: i32) -> (i32, i32, i32) {
    %c0_i32 = arith.constant 0 : i32
    %c0_i32_0 = arith.constant 0 : i32
    %c0_i32_1 = arith.constant 0 : i32
    return %arg0, %c0_i32, %c0_i32_0 : i32, i32, i32
  }
}

</mosaic_0001>

<bundles_post_ra>
// kernel: tpu_custom_call.1
= control target key start
LH: loop header
LB: loop body
LE: loop exit
PB: predicated region body
PF: predicated region fallthrough
CT: control target
= control target key end

     0   :  { %s2182_s0 = inlined_call_operand.hbm [shape: f32[2,16,64], index: 0, kind: input, shape index: {}]   ;;  %s2183_s1 = inlined_call_operand.hbm [shape: f32[2,16,64], index: 1, kind: input, shape index: {}]   ;;  %s2184_s2 = inlined_call_operand.vmem [shape: f32[2,1,64], index: 2, kind: input, shape index: {}]   ;;  %s2185_s3 = inlined_call_operand.hbm [shape: bf16[64,64], index: 3, kind: input, shape index: {}]   ;;  %s2186_s4 = inlined_call_operand.vmem [shape: f32[1,64], index: 4, kind: input, shape index: {}]   ;;  %s2187_s5 = inlined_call_operand.hbm [shape: bf16[192,128], index: 5, kind: input, shape index: {}]   ;;  %s2188_s6 = inlined_call_operand.vmem [shape: f32[1,128], index: 6, kind: input, shape index: {}]   ;;  %s2189_s7 = inlined_call_operand.hbm [shape: bf16[64,128], index: 7, kind: input, shape index: {}]   ;;  %s2190_s8 = inlined_call_operand.vmem [shape: f32[1,128], index: 8, kind: input, shape index: {}]   ;;  %s2191_s9 = inlined_call_operand.hbm [shape: bf16[64,128], index: 9, kind: input, shape index: {}]   ;;  %s2192_s10 = inlined_call_operand.vmem [shape: f32[1,128], index: 10, kind: input, shape index: {}]   ;;  %s2193_s11 = inlined_call_operand.vmem [shape: f32[1,128], index: 11, kind: input, shape index: {}]   ;;  %s2194_s12 = inlined_call_operand.vmem [shape: f32[1,128], index: 12, kind: input, shape index: {}]   ;;  %s2195_s13 = inlined_call_operand.hbm [shape: f32[2,16,128], index: 13, kind: output, shape index: {}]  }
   0x1   :  { %2205 = sst [smem:[#allocation26_spill]] %s2182_s0 }
   0x2   :  { %2206 = sst [smem:[#allocation27_spill]] %s2185_s3 }
   0x3   :  { %2207 = sst [smem:[#allocation28_spill]] %s2187_s5 }
   0x4   :  { %2208 = sst [smem:[#allocation29_spill]] %s2189_s7 }
   0x5   :  { %2209 = sst [smem:[#allocation30_spill]] %s2191_s9 }
   0x6   :  { %18 = vsyncpa [#allocation4], 0 }
   0x7   :  { %20 = vsyncpa [#allocation4 + $0x1], 0 }
   0x8   :  { %21 = vsyncpa [#allocation7], 0 }
   0x9   :  { %23 = vsyncpa [#allocation7 + $0x1], 0 }
   0xa   :  { %24 = vsyncpa [#allocation10], 0 }
   0xb   :  { %25 = vsyncpa [#allocation13], 0 }
   0xc   :  { %26 = vsyncpa [#allocation5], 0 }
   0xd   :  { %28 = vsyncpa [#allocation5 + $0x1], 0  ;;  %s1821_s25 = smov 0   ;;  %s1823_s26 = smov 0  }
   0xe   :  { %s1825_s27 = smov 0   ;;  %s1827_s28 = smov 0  }
   0xf LB: > { %2210 = sst [smem:[#allocation21_spill]] %s1720_s25  ;;  %s1842_s29 = sadd.s32 4294967295, %s1732_s28   ;;  %s1732_s28 = sphi %s1827_s28, %s2239_s28   ;;  %s1728_s27 = sphi %s1825_s27, %s2241_s27   ;;  %s1724_s26 = sphi %s1823_s26, %s2243_s26   ;;  %s1720_s25 = sphi %s1821_s25, %s2242_s25  }
  0x10   : > { %2211 = sst [smem:[#allocation22_spill]] %s1728_s27  ;;  %s1234_s30 = sadd.s32 4294967294, %s1732_s28  }
  0x11   : > { %p54_p0 = scmp.ne.s32.totalorder %s1724_s26, %s1720_s25  ;;  %p2198_p1 = scmp.eq.s32.totalorder %s1842_s29, 0 }
  0x12   : > { %p340_p2 = scmp.eq.s32.totalorder %s1842_s29, 1  ;;  %p346_p3 = scmp.eq.s32.totalorder %s1234_s30, 1 }
  0x13   : > { %p1851_p4 = por %p2198_p1, %p54_p0  ;;  %p1235_p5 = scmp.ge.s32.totalorder %s1732_s28, 1 }
  0x14   : > { %p1856_p6 = por %p346_p3, %p54_p0  ;;  %p353_p7 = scmp.lt.s32.totalorder %s1732_s28, 3 }
  0x15   : > { %s2212_s14 = scalar_select %p1851_p4, 1, 0 }
  0x16   : > { %s2213_s15 = scalar_select %p1856_p6, 1, 0 }
  0x17   : > { %p1861_p8 = pnand %p1235_p5, %p353_p7  ;;  %s1734_s17 = smov [#allocation8]  }
  0x18   : > { %2214 = sst [smem:[#allocation23_spill]] %s2213_s15  ;;  %s365_s18 = sshll.u32 %s1734_s17, 4  ;;  %s366_s18 = int_to_ptr.vmem [resolvable:$true] %s365_s18 }
  0x19   : > { %p1369_p9 = pneg %p1861_p8  ;;  %s1735_s20 = smov [#allocation9]  }
  0x1a   : > { %s381_s21 = sshll.u32 %s1735_s20, 4  ;;  %s1736_s22 = smov [#allocation11]   ;;  %s382_s21 = int_to_ptr.vmem [resolvable:$true] %s381_s21 }
  0x1b   : > { %p1870_p11 = pnand %p1369_p9, %p2198_p1  ;;  %s397_s23 = sshll.u32 %s1736_s22, 4  ;;  %s398_s23 = int_to_ptr.vmem [resolvable:$true] %s397_s23 }
  0x1c   : > { %s1503_s24 = scalar_lea.vmem %s366_s18, 512  ;;  %p1511_p5 = scmp.lt.s32.totalorder %s366_s18, %s366_s18 }
  0x1d   : > { %p1494_p12 = pneg %p1870_p11  ;;  %p1504_p13 = scmp.ne.s32.totalorder %s366_s18, %s1503_s24 }
  0x1e   : > { %p1512_p7 = scmp.lt.s32.totalorder %s1503_s24, %s1503_s24 }
  0x1f   : > { %p1506_p0 = pnand %p1504_p13, %p1494_p12 }
  0x20   : > { %p1513_p9 = por %p1512_p7, %p1511_p5 }
  0x21   : > { %p1507_p3 = pneg %p1506_p0 }
  0x23   : > { %p1514_p10 = pnand %p1513_p9, %p1507_p3 }
  0x25   : > { %1517 = shalt.err (!%p1514_p10)
}
  0x26   : > { %s1737_s30 = smov 64   ;;  %s1738_s17 = smov 4  }
  0x27   : > { %s2217_s3 = sld [smem:[#allocation27_spill]]  ;;  %s1529_s15 = scalar_lea.vmem %s382_s21, 1536 }
  0x28   : > { %p1530_p13 = scmp.ne.s32.totalorder %s382_s21, %s1529_s15  ;;  %p1537_p3 = scmp.lt.s32.totalorder %s382_s21, %s382_s21 }
  0x29   : > { %p1538_p10 = scmp.lt.s32.totalorder %s1529_s15, %s1529_s15 }
  0x2a   : > { %p1532_p0 = pnand %p1530_p13, %p1494_p12 }
  0x2b   : > { %p1539_p7 = por %p1538_p10, %p1537_p3 }
  0x2c   : > { %p1533_p5 = pneg %p1532_p0 }
  0x2d   : > { %1372 = dma.hbm_to_vmem [thread:$0]  (!%p1870_p11), %s2217_s3, 512, %s366_s18, [#allocation7], %s1737_s30, %s1737_s30, %s1738_s17  }
  0x2e   : > { %p1540_p9 = pnand %p1539_p7, %p1533_p5 }
  0x30   : > { %1543 = shalt.err (!%p1540_p9)
}
  0x31   : > { %s2218_s5 = sld [smem:[#allocation28_spill]]  ;;  %s1555_s18 = scalar_lea.vmem %s398_s23, 512 }
  0x32   : > { %p1556_p1 = scmp.ne.s32.totalorder %s398_s23, %s1555_s18  ;;  %p1563_p3 = scmp.lt.s32.totalorder %s398_s23, %s398_s23 }
  0x33   : > { %p1564_p5 = scmp.lt.s32.totalorder %s1555_s18, %s1555_s18 }
  0x34   : > { %p1558_p13 = pnand %p1556_p1, %p1494_p12 }
  0x35   : > { %p1565_p10 = por %p1564_p5, %p1563_p3 }
  0x36   : > { %p1559_p0 = pneg %p1558_p13 }
  0x37   : > { %1375 = dma.hbm_to_vmem [thread:$0]  (!%p1870_p11), %s2218_s5, 1536, %s382_s21, [#allocation10], %s1737_s30, %s1737_s30, %s1738_s17  }
  0x38   : > { %p1566_p7 = pnand %p1565_p10, %p1559_p0 }
  0x3a   : > { %1569 = shalt.err (!%p1566_p7)
}
  0x3b   : > { %s2219_s7 = sld [smem:[#allocation29_spill]]  ;;  %s1739_s21 = smov [#allocation12]  }
  0x3c   : > { %s413_s20 = sshll.u32 %s1739_s21, 4  ;;  %s414_s20 = int_to_ptr.vmem [resolvable:$true] %s413_s20 }
  0x3d   : > { %s1581_s22 = scalar_lea.vmem %s414_s20, 512  ;;  %p1589_p0 = scmp.lt.s32.totalorder %s414_s20, %s414_s20 }
  0x3e   : > { %p1582_p1 = scmp.ne.s32.totalorder %s414_s20, %s1581_s22  ;;  %p1590_p3 = scmp.lt.s32.totalorder %s1581_s22, %s1581_s22 }
  0x40   : > { %p1584_p9 = pnand %p1582_p1, %p1494_p12  ;;  %p1591_p5 = por %p1590_p3, %p1589_p0 }
  0x41   : > { %1378 = dma.hbm_to_vmem [thread:$0]  (!%p1870_p11), %s2219_s7, 512, %s398_s23, [#allocation10], %s1737_s30, %s1737_s30, %s1738_s17  }
  0x42   : > { %p1585_p13 = pneg %p1584_p9 }
  0x44   : > { %p1592_p10 = pnand %p1591_p5, %p1585_p13 }
  0x46   : > { %1595 = shalt.err (!%p1592_p10)
}
  0x47   : > { %s2220_s9 = sld [smem:[#allocation30_spill]]  ;;  %s1921_s19 = sadd.s32 1, %s1732_s28  }
  0x48   : > { %2221 = sst [smem:[#allocation24_spill]] %s1921_s19  ;;  %s41_s18 = sadd.s32 1, %s1728_s27 }
  0x49   : > { %s38_s25 = ssub.s32 %s1732_s28, %s1921_s19  ;;  %p48_p12 = scmp.ne.s32.totalorder %s1728_s27, %s1724_s26 }
  0x4a   : > { %p39_p7 = scmp.eq.s32.totalorder %s38_s25, 0  ;;  %p49_p1 = scmp.eq.s32.totalorder %s1732_s28, 0 }
  0x4b   : > { %p1931_p9 = por %p340_p2, %p48_p12  ;;  %p1397_p13 = scmp.lt.s32.totalorder %s1732_s28, 2 }
  0x4c   : > { %s1937_s21 = scalar_select %p39_p7, %s1728_s27, %s41_s18  }
  0x4d   : > { %1381 = dma.hbm_to_vmem [thread:$0]  (!%p1870_p11), %s2220_s9, 512, %s414_s20, [#allocation13], %s1737_s30, %s1737_s30, %s1738_s17  }
  0x4e   : > { %s2222_s15 = scalar_select %p1931_p9, 1, 0 }
  0x4f   : > { %2223 = sst [smem:[#allocation25_spill]] %s1937_s21  ;;  %p50_p0 = por %p49_p1, %p48_p12 }
  0x50   : > { %s436_s22 = sand.u32 1, %s1728_s27   ;;  %s2199_s30 = sshll.u32 %s1732_s28, 8 }
  0x51   : > { %s1940_s23 = sshll.u32 %s436_s22, 4  ;;  %s2224_s0 = sld [smem:[#allocation26_spill]] }
  0x52   : > { %s440_s25 = scalar_lea.vmem [#allocation3], %s1940_s23  ;;  %p1953_p2 = pnand %p1397_p13, %p50_p0 }
  0x53   : > { %s447_s3 = sshll.u32 %s440_s25, 4  ;;  %s1957_s5 = scalar_lea.sflag [#allocation4], %s436_s22  ;;  %s1951_s3 = int_to_ptr.vmem [resolvable:$true] %s447_s3 }
  0x54   : > { %p1598_p3 = pneg %p1953_p2 }
  0x57   : > { %s1948_s24 = scalar_lea.hbm %s2224_s0, %s2199_s30  ;;  %s1601_s25 = scalar_lea.hbm %s2224_s0, 512 }
  0x58   : > { %s1596_s7 = scalar_lea.hbm %s1948_s24, 256  ;;  %p1602_p12 = scmp.lt.s32.totalorder %s1948_s24, %s2224_s0 }
  0x59   : > { %p1597_p11 = scmp.ne.s32.totalorder %s1948_s24, %s1596_s7  ;;  %p1603_p7 = scmp.lt.s32.totalorder %s1601_s25, %s1596_s7 }
  0x5b   : > { %p1599_p5 = pnand %p1598_p3, %p1597_p11  ;;  %p1604_p1 = por %p1603_p7, %p1602_p12 }
  0x5d   : > { %p1600_p10 = pneg %p1599_p5 }
  0x5f   : > { %p1605_p13 = pnand %p1604_p1, %p1600_p10 }
  0x61   : > { %1608 = shalt.err (!%p1605_p13)
}
  0x62   : > { %s1609_s22 = scalar_lea.vmem %s1951_s3, 256  ;;  %s1740_s17 = smov [#allocation3]  }
  0x63   : > { %p1610_p0 = scmp.ne.s32.totalorder %s1951_s3, %s1609_s22  ;;  %s1614_s20 = sshll.u32 %s1740_s17, 4  ;;  %s1615_s20 = int_to_ptr.vmem [resolvable:$false] %s1614_s20 }
  0x64   : > { %s1616_s21 = scalar_lea.vmem %s1615_s20, 512  ;;  %p1617_p6 = scmp.lt.s32.totalorder %s1951_s3, %s1615_s20 }
  0x65   : > { %p1612_p11 = pnand %p1610_p0, %p1598_p3  ;;  %p1618_p9 = scmp.lt.s32.totalorder %s1616_s21, %s1609_s22 }
  0x67   : > { %p1613_p5 = pneg %p1612_p11  ;;  %p1619_p4 = por %p1618_p9, %p1617_p6 }
  0x69   : > { %p1620_p12 = pnand %p1619_p4, %p1613_p5 }
  0x6b   : > { %1623 = shalt.err (!%p1620_p12)
}
  0x6c   : > { %s1741_s7 = smov 128   ;;  %s1742_s9 = smov 8  }
  0x6d   : > { %1385 = dma.hbm_to_vmem [thread:$0]  (!%p1953_p2), %s1948_s24, 256, %s1951_s3, %s1957_s5, %s1741_s7, %s1741_s7, %s1742_s9  }
  0x6e   : > { %s2226_s30 = sshll.u32 %s1732_s28, 8  ;;  %s461_s17 = scalar_lea.vmem [#allocation6], %s1940_s23 }
  0x6f   : > { %s1992_s22 = scalar_lea.hbm %s2183_s1, %s2226_s30  ;;  %s468_s20 = sshll.u32 %s461_s17, 4  ;;  %s1995_s20 = int_to_ptr.vmem [resolvable:$true] %s468_s20 }
  0x70   : > { %s457_s0 = sand.u32 1, %s1732_s28   ;;  %s1624_s19 = scalar_lea.hbm %s1992_s22, 256 }
  0x71   : > { %s458_s27 = scalar_lea.sflag [#allocation7], %s457_s0  ;;  %p1625_p4 = scmp.ne.s32.totalorder %s1992_s22, %s1624_s19 }
  0x72   : > { %s1629_s24 = scalar_lea.hbm %s2183_s1, 512  ;;  %p1630_p10 = scmp.lt.s32.totalorder %s1992_s22, %s2183_s1 }
  0x73   : > { %p1627_p6 = pnand %p1625_p4, %p1598_p3  ;;  %p1631_p7 = scmp.lt.s32.totalorder %s1629_s24, %s1624_s19 }
  0x75   : > { %p1628_p9 = pneg %p1627_p6  ;;  %p1632_p1 = por %p1631_p7, %p1630_p10 }
  0x77   : > { %p1633_p13 = pnand %p1632_p1, %p1628_p9 }
  0x79   : > { %1636 = shalt.err (!%p1633_p13)
}
  0x7a   : > { %s1637_s0 = scalar_lea.vmem %s1995_s20, 256  ;;  %s1743_s23 = smov [#allocation6]  }
  0x7b   : > { %p1638_p0 = scmp.ne.s32.totalorder %s1995_s20, %s1637_s0  ;;  %s1642_s25 = sshll.u32 %s1743_s23, 4  ;;  %s1643_s25 = int_to_ptr.vmem [resolvable:$false] %s1642_s25 }
  0x7c   : > { %s1644_s17 = scalar_lea.vmem %s1643_s25, 512  ;;  %p1645_p12 = scmp.lt.s32.totalorder %s1995_s20, %s1643_s25 }
  0x7d   : > { %p1640_p11 = pnand %p1638_p0, %p1598_p3  ;;  %p1646_p4 = scmp.lt.s32.totalorder %s1644_s17, %s1637_s0 }
  0x7f   : > { %p1641_p5 = pneg %p1640_p11  ;;  %p1647_p6 = por %p1646_p4, %p1645_p12 }
  0x81   : > { %p1648_p10 = pnand %p1647_p6, %p1641_p5 }
  0x83   : > { %1651 = shalt.err (!%p1648_p10)
}
  0x84   : > { %1388 = dma.hbm_to_vmem [thread:$0]  (!%p1953_p2), %s1992_s22, 256, %s1995_s20, %s458_s27, %s1741_s7, %s1741_s7, %s1742_s9  }
  0x85   : > { %486 = sbr.rel (%p1861_p8) target bundleno = 1100 (0x44c), region = 72  ;;  %s2026_s19 = sand.u32 (!%p1861_p8), 1, %s1724_s26  }
  0x86   : > { %s2029_s3 = sshll.u32 (!%p1861_p8), %s2026_s19, 4  ;;  %s489_s5 = scalar_lea.sflag (!%p1861_p8), [#allocation4], %s2026_s19 }
  0x87   : > { %s492_s18 = scalar_lea.vmem (!%p1861_p8), [#allocation3], %s2029_s3  ;;  %p2227_p3 = scmp.ne.s32.totalorder (!%p1861_p8), %s2212_s14, 0 }
  0x8a   : > { %1695 = dma.done.wait (%p2227_p3), %s489_s5, 256  }
  0x8b   : > { %1697 = vsyncadd (%p2227_p3), %s489_s5, 4294967040  ;;  %s497_s27 = sand.u32 1, %s1842_s29   ;;  %s501_s7 = scalar_lea.vmem [#allocation6], %s2029_s3 }
  0x8c   : > { %s498_s16 = scalar_lea.sflag [#allocation7], %s497_s27 }
  0x8d   : > { %1699 = dma.done.wait (%p2227_p3), %s498_s16, 256  }
  0x8e   : > { %1701 = vsyncadd (%p2227_p3), %s498_s16, 4294967040  ;;  %p2228_p8 = scmp.eq.s32.totalorder %s1842_s29, 0 }
  0x90   : > { %1703 = dma.done.wait (%p2228_p8), [#allocation7], 512   ;;  %p2229_p2 = pmov %p2228_p8 }
  0x92   : > { %1705 = vsyncadd (%p2229_p2), [#allocation7], 4294966784  ;;  %p2230_p9 = pmov %p2229_p2 }
  0x93   : > { %p2231_p7 = pmov %p2229_p2 }
  0x94   : > { %1707 = dma.done.wait (%p2230_p9), [#allocation10], 2048  }
  0x95   : > { %1709 = vsyncadd (%p2231_p7), [#allocation10], 4294965248  ;;  %p2232_p1 = pmov %p2229_p2 }
  0x97   : > { %1711 = dma.done.wait (%p2232_p1), [#allocation13], 512   ;;  %p2233_p13 = pmov %p2232_p1 }
  0x98   : > { %v1744_v0 = vmov 0.0   ;;  %vm1745_vm0 = vmmov 0   ;;  %p568_p0 = scmp.lt.s32.totalorder %s1842_s29, 1  ;;  %v1454_v1 = vld [vmem:[#allocation8 + $0x18] sm:$0xff]   ;;  %v1455_v2 = vld [vmem:[#allocation8 + $0x10] sm:$0xff]   ;;  %v1456_v3 = vld [vmem:[#allocation8 + $0x8] sm:$0xff]   ;;  %v653_v19 = vlaneseq }
  0x99   : > { %1713 = vsyncadd (%p2233_p13), [#allocation13], 4294966784  ;;  %1311 = vmatprep.subr.bf16.mxu0 %v1744_v0  ;;  %1319 = vmatprep.mubr.msk.bf16.mxu0 %vm1745_vm0, %v1744_v0  ;;  %vm609_vm1 = vcmask 523264   ;;  %v1457_v4 = vld [vmem:[#allocation8] sm:$0xff]   ;;  %vm659_vm2 = vcmask 517120   ;;  %v1458_v7 = vld [vmem:[#allocation9 + $0x38] sm:$0xff]  }
  0x9a   : > { %s569_s14 = scalar_select %p568_p0, %s1842_s29, 1  ;;  %1312 = vmatpush3.bf16.msra.mxu0 %v1454_v1  ;;  %660 = vst.msk [vmem:[#allocation2] sm:$0x3] %vm659_vm2, %v1744_v0  ;;  %663 = vst.msk [vmem:[#allocation2 + $0x12] sm:$0x3] %vm659_vm2, %v1744_v0  ;;  %v1746_v8 = vmov 0  }
  0x9b   : > { %1313 = vmatprep.subr.bf16.mxu0 %v1744_v0  ;;  %788 = vmatprep.subr.bf16.mxu1 %v1746_v8  ;;  %v1459_v9 = vld [vmem:[#allocation9 + $0x30] sm:$0xff]   ;;  %v1460_v10 = vld [vmem:[#allocation9 + $0x28] sm:$0xff]   ;;  %v1461_v11 = vld [vmem:[#allocation9 + $0x20] sm:$0xff]   ;;  %v654_v20 = vshrl.u32 %v653_v19, 7  ;;  %s1747_s21 = smov 64   ;;  %s567_s9 = scalar_lea.vmem [#allocation14], %s2029_s3 }
  0x9c   : > { %s570_s20 = scalar_lea.vmem %s2184_s2, %s569_s14  ;;  %789 = vmatpush1.bf16.msra.mxu1 %v1458_v7  ;;  %v1462_v12 = vld [vmem:[#allocation9 + $0x18] sm:$0xff]   ;;  %v1463_v13 = vld [vmem:[#allocation9 + $0x10] sm:$0xff]   ;;  %v1464_v14 = vld [vmem:[#allocation9 + $0x8] sm:$0xff]   ;;  %s1091_s22 = sshll.u32 %s567_s9, 4  ;;  %s2133_s22 = int_to_ptr.vmem [resolvable:$true] %s1091_s22 }
  0x9d   : > { %v574_v5 = vld [vmem:[%s570_s20] sm:$0x1]  ;;  %790 = vmatprep.subr.bf16.mxu1 %v1746_v8  ;;  %v1465_v15 = vld [vmem:[#allocation9] sm:$0xff]   ;;  %v1466_v16 = vld [vmem:[#allocation9 + $0x58] sm:$0xff]   ;;  %v2075_v22 = vsub.s32 0, %v654_v20  ;;  %s1295_s20 = sshll.u32 %s1842_s29, 8 }
  0x9e   : > { %1314 = vmatpush3.bf16.msra.mxu0 %v1455_v2  ;;  %v575_v6 = vpack.c.bf16 %v574_v5, %v574_v5  ;;  %v1467_v17 = vld [vmem:[#allocation9 + $0x50] sm:$0xff]   ;;  %v1468_v18 = vld [vmem:[#allocation9 + $0x48] sm:$0xff]   ;;  %v1469_v32 = vld [vmem:[#allocation9 + $0x40] sm:$0xff]   ;;  %s2138_s3 = scalar_lea.hbm %s2195_s13, %s1295_s20  ;;  %s1078_s29 = scalar_lea.sflag [#allocation5], %s2026_s19 }
  0x9f   : > { %1315 = vmatprep.subr.bf16.mxu0 %v1744_v0  ;;  %v584_v21 = vld [vmem:[%s2186_s4] sm:$0x1]  ;;  %v2079_v25 = vld [vmem:[%s492_s18] sm:$0xff]  ;;  %v1470_v34 = vld [vmem:[#allocation11 + $0x18] sm:$0xff]   ;;  %p2234_p5 = scmp.ne.s32.totalorder %s2222_s15, 0  ;;  %s1748_s0 = smov [#allocation14]  }
  0xa0   : > { %791 = vmatpush1.bf16.msra.mxu1 %v1459_v9  ;;  %v2083_v26 = vld [vmem:[%s492_s18 + $0x8] sm:$0xff]  ;;  %v1471_v35 = vld [vmem:[#allocation11 + $0x10] sm:$0xff]   ;;  %v1473_v43 = vld [vmem:[#allocation11] sm:$0xff]   ;;  %s1656_s23 = sshll.u32 %s1748_s0, 4  ;;  %s1657_s23 = int_to_ptr.vmem [resolvable:$false] %s1656_s23 }
  0xa1   : > { %792 = vmatprep.subr.bf16.mxu1 %v1746_v8  ;;  %v1472_v42 = vld [vmem:[#allocation11 + $0x8] sm:$0xff]   ;;  %v873_v44 = vld [vmem:[%s501_s7] sm:$0xff]  ;;  %v1474_v59 = vld [vmem:[#allocation12 + $0x18] sm:$0xff]   ;;  %s1658_s25 = scalar_lea.vmem %s1657_s23, 512  ;;  %p1659_p6 = scmp.lt.s32.totalorder %s2133_s22, %s1657_s23 }
  0xa2   : > { %1316 = vmatpush3.bf16.msra.mxu0 %v1456_v3  ;;  %v874_v45 = vld [vmem:[%s501_s7 + $0x8] sm:$0xff]  ;;  %v1475_v60 = vld [vmem:[#allocation12 + $0x10] sm:$0xff]  }
  0xa3   : > { %1317 = vmatprep.subr.bf16.mxu0 %v1744_v0  ;;  %v875_v46 = vpack.c.bf16 %v874_v45, %v873_v44  ;;  %v1476_v61 = vld [vmem:[#allocation12 + $0x8] sm:$0xff]  }
  0xa4   : > { %793 = vmatpush1.bf16.msra.mxu1 %v1460_v10  ;;  %v1260_v62 = vld [vmem:[%s2188_s6] ss:$0 sm:$0xff] }
  0xa5   : > { %794 = vmatprep.subr.bf16.mxu1 %v1746_v8 }
  0xa6   : > { %1318 = vmatpush3.bf16.msra.mxu0 %v1457_v4 }
  0xa7   : > { %1323 = vmatprep.subr.bf16.mxu0 %v1744_v0 }
  0xa8   : > { %795 = vmatpush1.bf16.msra.mxu1 %v1461_v11 }
  0xa9   : > { %1320 = vmatmul.mubr.msk.bf16.vlgmr.msra.gmra.mxu0 %vm609_vm1, %v575_v6  ;;  %796 = vmatprep.subr.bf16.mxu1 %v1746_v8 }
  0xaa   : > { %1331 = vmatprep.mubr.msk.bf16.mxu0 %vm1745_vm0, %v1744_v0  ;;  %1324 = vmatpush3.bf16.msra.mxu0 %v1470_v34 }
  0xab   : > { %1325 = vmatprep.subr.bf16.mxu0 %v1744_v0 }
  0xac   : > { %797 = vmatpush1.bf16.msra.mxu1 %v1462_v12 }
  0xad   : > { %798 = vmatprep.subr.bf16.mxu1 %v1746_v8 }
  0xae   : > { %1326 = vmatpush3.bf16.msra.mxu0 %v1471_v35 }
  0xaf   : > { %1327 = vmatprep.subr.bf16.mxu0 %v1744_v0 }
  0xb0   : > { %799 = vmatpush1.bf16.msra.mxu1 %v1463_v13 }
  0xb1   : > { %800 = vmatprep.subr.bf16.mxu1 %v1746_v8 }
  0xb2   : > { %1328 = vmatpush3.bf16.msra.mxu0 %v1472_v42 }
  0xb3   : > { %1329 = vmatprep.subr.bf16.mxu0 %v1744_v0 }
  0xb4   : > { %801 = vmatpush1.bf16.msra.mxu1 %v1464_v14 }
  0xb5   : > { %802 = vmatprep.subr.bf16.mxu1 %v1746_v8 }
  0xb6   : > { %1330 = vmatpush3.bf16.msra.mxu0 %v1473_v43 }
  0xb7   : > { %1335 = vmatprep.subr.bf16.mxu0 %v1744_v0 }
  0xb8   : > { %803 = vmatpush1.bf16.msra.mxu1 %v1465_v15 }
  0xb9   : > { %812 = vmatprep.subr.bf16.mxu1 %v1746_v8  ;;  %1332 = vmatmul.mubr.msk.bf16.vlgmr.msra.gmra.mxu0 %vm609_vm1, %v875_v46 }
  0xba   : > { %1343 = vmatprep.mubr.msk.bf16.mxu0 %vm1745_vm0, %v1744_v0  ;;  %1336 = vmatpush3.bf16.msra.mxu0 %v1474_v59 }
  0xbb   : > { %1337 = vmatprep.subr.bf16.mxu0 %v1744_v0 }
  0xbc   : > { %813 = vmatpush2.bf16.msra.mxu1 %v1466_v16 }
  0xbd   : > { %814 = vmatprep.subr.bf16.mxu1 %v1746_v8 }
  0xbe   : > { %1338 = vmatpush3.bf16.msra.mxu0 %v1475_v60 }
  0xbf   : > { %1339 = vmatprep.subr.bf16.mxu0 %v1744_v0 }
  0xc0   : > { %815 = vmatpush2.bf16.msra.mxu1 %v1467_v17 }
  0xc1   : > { %816 = vmatprep.subr.bf16.mxu1 %v1746_v8 }
  0xc2   : > { %1340 = vmatpush3.bf16.msra.mxu0 %v1476_v61 }
  0xc3   : > { %1341 = vmatprep.subr.bf16.mxu0 %v1744_v0 }
  0xc4   : > { %817 = vmatpush2.bf16.msra.mxu1 %v1468_v18 }
  0xc5   : > { %818 = vmatprep.subr.bf16.mxu1 %v1746_v8 }
  0xc8   : > { %819 = vmatpush2.bf16.msra.mxu1 %v1469_v32 }
 0x169   : > { %v647_v23 = vpop.f32.mrf.mxu0 }
 0x16a   : > { %v648_v24 = vadd.f32 %v647_v23, %v584_v21 }
 0x16b   : > { %v1321_v27 = vpop.f32.mrf.mxu0 }
 0x16c   : > { %v656_v28 = vrot.slane %v648_v24, %v2075_v22 }
 0x16d   : > { %v650_v29 = vpop.f32.mrf.mxu0 }
 0x16e   : > { %v657_v30 = vadd.f32 %v656_v28, %v2079_v25  ;;  %v658_v31 = vadd.f32 %v656_v28, %v2083_v26 }
 0x16f   : > { %v1322_v33 = vpop.f32.mrf.mxu0 }
 0x170   : > { %661 = vst.msk [vmem:[#allocation2 + $0x2] sm:$0xff] %vm609_vm1, %v657_v30  ;;  %662 = vst.msk [vmem:[#allocation2 + $0xa] sm:$0xff] %vm609_vm1, %v658_v31  ;;  %v850_v30 = vld [vmem:[%s2193_s11] sm:$0x1] }
 0x171   : > { %v854_v33 = vld [vmem:[%s2194_s12] sm:$0x1] }
 0x177   : > { %v668_v36 = vld [vmem:[#allocation2 + $0x4] sm:$0xff]  ;;  %v669_v37 = vld [vmem:[#allocation2 + $0xc] sm:$0xff] }
 0x178   : > { %v666_v38 = vld [vmem:[#allocation2 + $0x2] sm:$0xff]  ;;  %v681_v39 = vpack.c.bf16 %v669_v37, %v668_v36  ;;  %v667_v40 = vld [vmem:[#allocation2 + $0xa] sm:$0xff]  ;;  %v1274_v37 = vld [vmem:[%s2190_s8] ss:$0 sm:$0xff] }
 0x179   : > { %v1449_v41 = vpack.i.bf16 %v667_v40, %v666_v38  ;;  %v664_v50 = vld [vmem:[#allocation2] sm:$0xff]  ;;  %v665_v51 = vld [vmem:[#allocation2 + $0x8] sm:$0xff]  ;;  %v952_v55 = vpop.f32.mrf.mxu0 }
 0x17a   : > { %1273 = vmatprep.mubr.msk.bf16.mxu1 %vm609_vm1, %v681_v39  ;;  %v953_v42 = vadd.f32 %v1274_v37, %v952_v55 }
 0x17b   : > { %1450 = vrot.lane.b32.xlu0 %v1449_v41, %s1747_s21  ;;  %v1333_v56 = vpop.f32.mrf.mxu0 }
 0x17d   : > { %v955_v57 = vpop.f32.mrf.mxu0 }
 0x17e   : > { %v956_v44 = vadd.f32 %v1274_v37, %v955_v57 }
 0x17f   : > { %v1334_v58 = vpop.f32.mrf.mxu0 }
 0x1ed   : > { %v1451_v47 = vpop.permute.xlu0 %1450 }
 0x1ee   : > { %v1453_v48 = vunpack.i.h.bf16 %v1451_v47  ;;  %v1452_v49 = vunpack.i.l.bf16 %v1451_v47  ;;  %v1477_v47 = vld [vmem:[#allocation12] sm:$0xff]  }
 0x1ef   : > { %1342 = vmatpush3.bf16.msra.mxu0 %v1477_v47 }
 0x1f0   : > { %v678_v52 = vsel %vm609_vm1, %v664_v50, %v1452_v49  ;;  %v679_v53 = vsel %vm609_vm1, %v665_v51, %v1453_v48 }
 0x1f1   : > { %v680_v54 = vpack.c.bf16 %v679_v53, %v678_v52 }
 0x1f3   : > { %821 = vmatmul.mubr.bf16.vlgmr.msra.gmra.mxu1 %v680_v54 }
 0x2b3   : > { %v822_v63 = vpop.f32.mrf.mxu1 }
 0x2b4   : > { %v823_v2 = vadd.f32 %v1260_v62, %v822_v63 }
 0x2b5   : > { %v824_v1 = vpop.f32.mrf.mxu1 }
 0x2b6   : > { %v837_v6 = vmul.f32 %v823_v2, %v823_v2 }
 0x2b7   : > { %v825_v3 = vpop.f32.mrf.mxu1 }
 0x2b8   : > { %v826_v4 = vadd.f32 %v1260_v62, %v825_v3  ;;  %v1282_v62 = vld [vmem:[%s2192_s10] ss:$0 sm:$0xff] }
 0x2b9   : > { %v827_v5 = vpop.f32.mrf.mxu1 }
 0x2ba   : > { %v829_v7 = vadd.f32 %v826_v4, %v823_v2  ;;  %v838_v8 = vmul.f32 %v826_v4, %v826_v4 }
 0x2bc   : > { %v830_v9 = vrot.slane %v829_v7, 4  ;;  %v839_v10 = vadd.f32 %v838_v8, %v837_v6 }
 0x2be   : > { %v831_v11 = vadd.f32 %v830_v9, %v829_v7  ;;  %v840_v12 = vrot.slane %v839_v10, 4 }
 0x2c0   : > { %v832_v13 = vrot.slane %v831_v11, 2  ;;  %v841_v14 = vadd.f32 %v840_v12, %v839_v10 }
 0x2c2   : > { %v833_v0 = vadd.f32 %v832_v13, %v831_v11  ;;  %v842_v15 = vrot.slane %v841_v14, 2 }
 0x2c4   : > { %v834_v16 = vrot.slane %v833_v0, 1  ;;  %v843_v17 = vadd.f32 %v842_v15, %v841_v14 }
 0x2c6   : > { %v835_v18 = vadd.f32 %v834_v16, %v833_v0  ;;  %v844_v19 = vrot.slane %v843_v17, 1 }
 0x2c8   : > { %v836_v20 = vmul.f32 0.0625, %v835_v18  ;;  %v845_v21 = vadd.f32 %v844_v19, %v843_v17 }
 0x2ca   : > { %v846_v23 = vmul.f32 0.0625, %v845_v21  ;;  %v847_v24 = vmul.f32 %v836_v20, %v836_v20 }
 0x2cc   : > { %v848_v27 = vsub.f32 %v846_v23, %v847_v24 }
 0x2ce   : > { %v849_v28 = vmax.f32 %v848_v27, 0.0 }
 0x2d0   : > { %v851_v29 = vadd.f32 1e-05, %v849_v28 }
 0x2d2   : > { %1478 = vrsqrt.f32 %v851_v29 }
 0x2df   : > { %v1479_v31 = vpop.eup %1478 }
 0x2e0   : > { %v853_v32 = vmul.f32 %v1479_v31, %v850_v30 }
 0x2e2   : > { %v861_v34 = vrot.slane %v853_v32, %v2075_v22  ;;  %v855_v35 = vmul.f32 %v853_v32, %v836_v20 }
 0x2e4   : > { %v856_v36 = vsub.f32 %v854_v33, %v855_v35  ;;  %v864_v38 = vmul.f32 %v861_v34, %v826_v4  ;;  %v863_v39 = vmul.f32 %v861_v34, %v823_v2 }
 0x2e6   : > { %v869_v40 = vrot.slane %v856_v36, %v2075_v22 }
 0x2e8   : > { %v871_v41 = vadd.f32 %v869_v40, %v863_v39  ;;  %v872_v43 = vadd.f32 %v869_v40, %v864_v38 }
 0x2ea   : > { %v959_v45 = vadd.f32 %v953_v42, %v871_v41  ;;  %v960_v46 = vadd.f32 %v956_v44, %v872_v43 }
 0x2ec   : > { %1480 = vtanh.f32 %v959_v45  ;;  %v1280_v50 = vmul.f32 -1.442695, %v959_v45  ;;  %v1281_v51 = vmul.f32 -1.442695, %v960_v46 }
 0x2ed   : > { %1482 = vtanh.f32 %v960_v46 }
 0x2ee   : > { %1484 = vpow2.f32 %v1280_v50 }
 0x2ef   : > { %1486 = vpow2.f32 %v1281_v51 }
 0x2f9   : > { %v1481_v48 = vpop.eup %1480 }
 0x2fa   : > { %v1483_v49 = vpop.eup %1482  ;;  %977 = vrot.lane.b32.xlu0 %v1481_v48, %s1747_s21 }
 0x2fb   : > { %979 = vrot.lane.b32.xlu1 %v1483_v49, %s1747_s21  ;;  %v1485_v22 = vpop.eup %1484  ;;  %s1652_s21 = scalar_lea.vmem %s2133_s22, 256 }
 0x2fc   : > { %v1487_v52 = vpop.eup %1486  ;;  %v967_v53 = vadd.f32 1.0, %v1485_v22  ;;  %p1653_p11 = scmp.ne.s32.totalorder %s2133_s22, %s1652_s21  ;;  %p1660_p10 = scmp.lt.s32.totalorder %s1658_s25, %s1652_s21 }
 0x2fd   : > { %v968_v54 = vadd.f32 1.0, %v1487_v52 }
 0x2fe   : > { %1488 = vrcp.f32 %v967_v53  ;;  %p1654_p12 = pnand %p1653_p11, %p2234_p5  ;;  %p1661_p3 = por %p1660_p10, %p1659_p6 }
 0x2ff   : > { %1490 = vrcp.f32 %v968_v54 }
 0x300   : > { %p1655_p4 = pneg %p1654_p12 }
 0x302   : > { %p1662_p8 = pnand %p1661_p3, %p1655_p4 }
 0x30b   : > { %v1489_v55 = vpop.eup %1488 }
 0x30c   : > { %v1491_v57 = vpop.eup %1490 }
 0x36c   : > { %v978_v56 = vpop.permute.xlu0 %977 }
 0x36d   : > { %v980_v58 = vpop.permute.xlu1 %979  ;;  %v983_v59 = vmul.f32 %v1489_v55, %v978_v56 }
 0x36e   : > { %v984_v60 = vmul.f32 %v1491_v57, %v980_v58 }
 0x370   : > { %v985_v61 = vpack.c.bf16 %v984_v60, %v983_v59 }
 0x372   : > { %1344 = vmatmul.mubr.msk.bf16.vlgmr.msra.gmra.mxu0 %vm609_vm1, %v985_v61 }
 0x432   : > { %v1062_v63 = vpop.f32.mrf.mxu0 }
 0x433   : > { %v1063_v1 = vadd.f32 %v1282_v62, %v1062_v63 }
 0x434   : > { %v1345_v2 = vpop.f32.mrf.mxu0 }
 0x435   : > { %v1069_v3 = vadd.f32 %v1063_v1, %v2079_v25 }
 0x436   : > { %v1065_v4 = vpop.f32.mrf.mxu0 }
 0x437   : > { %v1071_v5 = vmul.f32 0.70710677, %v1069_v3  ;;  %v1066_v6 = vadd.f32 %v1282_v62, %v1065_v4 }
 0x438   : > { %v1346_v7 = vpop.f32.mrf.mxu0 }
 0x439   : > { %v1073_v8 = vsel %vm609_vm1, %v1071_v5, %v1063_v1  ;;  %v1070_v9 = vadd.f32 %v1066_v6, %v2083_v26 }
 0x43a   : > { %1075 = vst [vmem:[%s567_s9] sm:$0xff] %v1073_v8 }
 0x43b   : > { %v1072_v25 = vmul.f32 0.70710677, %v1070_v9 }
 0x43d   : > { %v1074_v10 = vsel %vm609_vm1, %v1072_v25, %v1066_v6 }
 0x43e   : > { %1076 = vst [vmem:[%s567_s9 + $0x8] sm:$0xff] %v1074_v10 }
 0x43f   : > { %1665 = shalt.err (!%p1662_p8)
}
 0x440   : > { %s1666_s17 = scalar_lea.hbm %s2138_s3, 256  ;;  %s1670_s27 = scalar_lea.hbm %s2195_s13, 512 }
 0x441   : > { %p1667_p2 = scmp.ne.s32.totalorder %s2138_s3, %s1666_s17  ;;  %p1671_p1 = scmp.lt.s32.totalorder %s2138_s3, %s2195_s13 }
 0x442   : > { %p1672_p13 = scmp.lt.s32.totalorder %s1670_s27, %s1666_s17 }
 0x443   : > { %p1668_p9 = pnand %p1667_p2, %p2234_p5 }
 0x444   : > { %p1673_p0 = por %p1672_p13, %p1671_p1 }
 0x445   : > { %p1669_p7 = pneg %p1668_p9 }
 0x447   : > { %p1674_p11 = pnand %p1673_p0, %p1669_p7 }
 0x449   : > { %1677 = shalt.err (!%p1674_p11)
}
 0x44a   : > { %s1749_s14 = smov 128   ;;  %s1750_s9 = smov 8  }
 0x44b   : > { %1367 = dma.vmem_to_hbm [thread:$0]  (%p2234_p5), %s2133_s22, 256, %s2138_s3, %s1078_s29, %s1749_s14, %s1749_s14, %s1750_s9  }
 0x44c PF: > { %s2235_s20 = sld [smem:[#allocation21_spill]]  ;;  %p2238_p4 = scmp.ge.s32.totalorder %s1732_s28, 2 }
 0x44d   : > { %s2236_s24 = sld [smem:[#allocation23_spill]] }
 0x452   : > { %s1106_s30 = sand.u32 1, %s2235_s20  }
 0x453   : > { %p2237_p12 = scmp.ne.s32.totalorder %s2236_s24, 0  ;;  %s1107_s21 = scalar_lea.sflag [#allocation5], %s1106_s30 }
 0x455   : > { %p1390_p6 = pnand %p2238_p4, %p2237_p12 }
 0x457   : > { %p1391_p10 = pneg %p1390_p6 }
 0x459   : > { %1715 = dma.done.wait (%p1391_p10), %s1107_s21, 256  }
 0x45a   : > { %1717 = vsyncadd (%p1391_p10), %s1107_s21, 4294967040  ;;  %s2239_s28 = sld [smem:[#allocation24_spill]]  ;;  %s2242_s25 = smov %s1724_s26 }
 0x45b   : > { %s2240_s0 = sld [smem:[#allocation22_spill]] }
 0x45c   : > { %s2241_s27 = sld [smem:[#allocation25_spill]] }
 0x460   : > { %p31_p3 = scmp.ge.s32.totalorder %s2239_s28, 4  }
 0x461   : > { %s2243_s26 = smov %s2240_s0 }
 0x462   :  { %33 = sbr.rel (!%p31_p3) target bundleno = 15 (0xf), region = 149 }
 0x467   :  { %1112 = vsyncpa [#allocation4], 1 }
 0x468   :  { %1114 = vsyncpa [#allocation4 + $0x1], 1 }
 0x469   :  { %1115 = vsyncpa [#allocation7], 1 }
 0x46a   :  { %1117 = vsyncpa [#allocation7 + $0x1], 1 }
 0x46b   :  { %1118 = vsyncpa [#allocation10], 1 }
 0x46c   :  { %1119 = vsyncpa [#allocation13], 1 }
 0x46d   :  { %1120 = vsyncpa [#allocation5], 1 }
 0x46e   :  { %1122 = vsyncpa [#allocation5 + $0x1], 1 }

</bundles_post_ra>
